<compile_context>
chip_gen: v6e
topology: v6e:2x2x1
jax: 0.10.0
libtpu: 0.0.40
codegen_flags: <defaults>
</compile_context>

<pallas_src>
import jax
import jax.numpy as jnp
from jax.experimental import pallas as pl
from jax.experimental.pallas import tpu as pltpu


def _awl_kernel(losses_ref, params_ref, out_ref):
    # losses_ref, params_ref: (1, num) f32 in VMEM.
    # out_ref: (1, 1) f32 in SMEM (scalar result, no VMEM store / output DMA).
    losses = losses_ref[...]              # (1, num)
    p = params_ref[...]                   # (1, num)
    p2 = p * p
    # 0.5 / p^2 * loss + log(1 + p^2), summed over all tasks.
    weighted = 0.5 * (losses * pl.reciprocal(p2)) + jnp.log(1.0 + p2)
    out_ref[0, 0] = jnp.sum(weighted)


def _awl_pallas(losses_2d: jax.Array, params_2d: jax.Array) -> jax.Array:
    """losses_2d, params_2d: (1, num) f32. Returns (1, 1) f32 (SMEM-backed)."""
    num = losses_2d.shape[1]
    cost = pl.CostEstimate(
        flops=10 * num,            # mul/div/add per task
        transcendentals=2 * num,   # log + reciprocal refine
        bytes_accessed=8 * num + 4,
    )
    return pl.pallas_call(
        _awl_kernel,
        out_shape=jax.ShapeDtypeStruct((1, 1), jnp.float32),
        # Single block == full array: no (8,128) tiling constraint, no grid loop,
        # one invocation, two tiny input DMAs, scalar result via SMEM.
        in_specs=[
            pl.BlockSpec((1, num), lambda: (0, 0)),
            pl.BlockSpec((1, num), lambda: (0, 0)),
        ],
        out_specs=pl.BlockSpec(memory_space=pltpu.MemorySpace.SMEM),
        cost_estimate=cost,
    )(losses_2d, params_2d)


def automatic_weighted_loss(losses: jax.Array, params: jax.Array) -> jax.Array:
    """Drop-in equivalent of AutomaticWeightedLoss.forward.

    losses: (num,) per-task scalar losses; params: (num,) learned weights.
    Returns a scalar f32. Call under jax.jit so the reshapes / scalar extract
    fuse with surrounding work.
    """
    losses_2d = losses.astype(jnp.float32).reshape(1, -1)   # free metadata reshape
    params_2d = params.astype(jnp.float32).reshape(1, -1)
    out = _awl_pallas(losses_2d, params_2d)                  # (1, 1) f32
    return out[0, 0]


# TODO(synk): if num ever grows to hundreds+ tasks (or per-element losses),
# repack sublane-dense (e.g. (8, num/8)), tile the lane axis with a grid marked
# 'arbitrary', accumulate into a (1,1) scratch and finalize with pl.when(last);
# on v7x keep blocks within the 32 MiB scoped-VMEM default.


if __name__ == "__main__":
    num = 2

    # Deterministic parameter init matching the module: torch.ones(num).
    params = jnp.ones((num,), dtype=jnp.float32)

    # Deterministic example per-task scalar "losses".
    key = jax.random.PRNGKey(0)
    losses = jax.random.uniform(key, (num,), dtype=jnp.float32, minval=0.1, maxval=2.0)

    awl = jax.jit(automatic_weighted_loss)
    result = jax.block_until_ready(awl(losses, params))

    # Reference check in plain JAX (same math as the PyTorch forward).
    ref = jnp.sum(0.5 / params**2 * losses + jnp.log(1.0 + params**2))
    assert jnp.allclose(result, ref, rtol=1e-5, atol=1e-6), (result, ref)

    print("KERNEL_OK")
</pallas_src>

<mosaic_0001>
module attributes {stable_mosaic.version = 11 : i64} {
  func.func @_awl_kernel(%arg0: memref<1x2xf32, #tpu.memory_space<vmem>>, %arg1: memref<1x2xf32, #tpu.memory_space<vmem>>, %arg2: memref<1x1xf32, #tpu.memory_space<smem>>) attributes {dimension_semantics = [], scalar_prefetch = 0 : i64, scratch_operands = 0 : i64, tpu.core_type = #tpu.core_type<tc>} {
    %c0 = arith.constant 0 : index
    %c0_0 = arith.constant 0 : index
    %0 = vector.load %arg0[%c0, %c0_0] : memref<1x2xf32, #tpu.memory_space<vmem>>, vector<1x2xf32>
    %c0_1 = arith.constant 0 : index
    %c0_2 = arith.constant 0 : index
    %1 = vector.load %arg1[%c0_1, %c0_2] : memref<1x2xf32, #tpu.memory_space<vmem>>, vector<1x2xf32>
    %2 = arith.mulf %1, %1 : vector<1x2xf32>
    %3 = tpu.reciprocal %2 : vector<1x2xf32> -> vector<1x2xf32>
    %4 = arith.mulf %0, %3 : vector<1x2xf32>
    %cst = arith.constant 5.000000e-01 : f32
    %5 = vector.broadcast %cst : f32 to vector<1x2xf32>
    %6 = arith.mulf %5, %4 : vector<1x2xf32>
    %cst_3 = arith.constant 1.000000e+00 : f32
    %7 = vector.broadcast %cst_3 : f32 to vector<1x2xf32>
    %8 = arith.addf %7, %2 : vector<1x2xf32>
    %9 = math.log %8 : vector<1x2xf32>
    %10 = arith.addf %6, %9 : vector<1x2xf32>
    %11 = vector.shape_cast %10 : vector<1x2xf32> to vector<1x1x2xf32>
    %cst_4 = arith.constant dense<0.000000e+00> : vector<1xf32>
    %12 = vector.multi_reduction <add>, %11, %cst_4 [1, 2] : vector<1x1x2xf32> to vector<1xf32>
    %13 = vector.shape_cast %12 : vector<1xf32> to vector<1x1x1xf32>
    %14 = vector.extract %13[0, 0, 0] : f32 from vector<1x1x1xf32>
    %c0_5 = arith.constant 0 : index
    %c0_6 = arith.constant 0 : index
    %15 = memref.load %arg2[%c0_5, %c0_6] : memref<1x1xf32, #tpu.memory_space<smem>>
    memref.store %14, %arg2[%c0_5, %c0_6] : memref<1x1xf32, #tpu.memory_space<smem>>
    return
  }
}

</mosaic_0001>

<bundles_post_ra>
// kernel: automatic_weighted_loss.1
= control target key start
LH: loop header
LB: loop body
LE: loop exit
PB: predicated region body
PF: predicated region fallthrough
CT: control target
= control target key end

     0   :  { %s90_s0 = inlined_call_operand.vmem [shape: f32[1,2], index: 0, kind: input, shape index: {}]   ;;  %s91_s1 = inlined_call_operand.vmem [shape: f32[1,2], index: 1, kind: input, shape index: {}]   ;;  %s92_s2 = inlined_call_operand.hbm [shape: f32[1,1], index: 2, kind: output, shape index: {}]  }
   0x1   :  { %v13_v0 = vld [vmem:[%s91_s1] sm:$0x1] }
   0x2   :  { %v14_v1 = vmul.f32 %v13_v0, %v13_v0 }
   0x3   :  { %7 = vsyncpa [#allocation3], 0  ;;  %v12_v3 = vld [vmem:[%s90_s0] sm:$0x1]  ;;  %vm22_vm0 = vcmask 8192   ;;  %s65_s0 = smov [#allocation2]  }
   0x4   :  { %51 = vrcp.f32 %v14_v1  ;;  %v18_v2 = vadd.f32 1.0, %v14_v1 }
   0x6   :  { %53 = vlog2.f32 %v18_v2 }
  0x11   :  { %v52_v4 = vpop.eup %51 }
  0x12   :  { %v16_v5 = vmul.f32 %v52_v4, %v12_v3 }
  0x13   :  { %v54_v6 = vpop.eup %53 }
  0x14   :  { %v17_v7 = vmul.f32 0.5, %v16_v5  ;;  %v20_v8 = vmul.f32 0.6931472, %v54_v6 }
  0x16   :  { %v21_v9 = vadd.f32 %v20_v8, %v17_v7 }
  0x18   :  { %v23_v10 = vsel %vm22_vm0, %v21_v9, 0.0 }
  0x19   :  { %24 = vadd.xlane.f32.xlu0 %v23_v10 }
  0xa2   :  { %v25_v11 = vpop.xlane.xlu0 %24 }
  0xa3   :  { %v26_v12 = vrot.slane %v25_v11, 4 }
  0xa5   :  { %v27_v13 = vadd.f32 %v26_v12, %v25_v11 }
  0xa7   :  { %v28_v14 = vrot.slane %v27_v13, 2 }
  0xa9   :  { %v29_v15 = vadd.f32 %v28_v14, %v27_v13 }
  0xab   :  { %v30_v16 = vrot.slane %v29_v15, 1 }
  0xad   :  { %v31_v17 = vadd.f32 %v30_v16, %v29_v15 }
  0xaf   :  { %48 = vpush %v31_v17 }
  0xe0   :  { %s49_s1 = spop %48 }
  0xe1   :  { %34 = sst [smem:[#allocation2]] %s49_s1 }
  0xe2   :  { %42 = dma.smem_to_hbm %s65_s0, 16, %s92_s2, [#allocation3]  }
  0xe3   :  { %63 = dma.done.wait [#allocation3], 16  }
  0xe4   :  { %64 = vsyncadd [#allocation3], 4294967280 }
  0xe5   :  { %46 = sfence }
  0xe6   :  { %47 = vsyncpa [#allocation3], 1 }

</bundles_post_ra>
